<compile_context>
chip_gen: v7x
topology: tpu7x:2x2x1
jax: 0.10.0
libtpu: 0.0.40
codegen_flags: <defaults>
</compile_context>

<pallas_src>
import jax
import jax.numpy as jnp
from jax.experimental import pallas as pl
from jax.experimental.pallas import tpu as pltpu


def _make_split_kernel(d: int):
    """De-interleave kernel for packed rows: (.., 2*d) -> even (.., :d), odd (.., d:)."""

    def split_kernel(x_ref, even_ref, odd_ref):
        # x_ref:    (TR, 2*d)   packed pairs (even | odd) along the lane axis
        # even_ref: (TR, d)
        # odd_ref:  (TR, d)
        even_ref[...] = x_ref[:, :d]
        odd_ref[...] = x_ref[:, d:]

    return split_kernel


def splitting(x: jax.Array,
              *,
              max_rows_per_tile: int | None = None,
              vmem_budget_bytes: int = 24 * 1024 * 1024):
    """Pallas equivalent of Splitting.forward. Returns ((even, odd), flag)."""
    B, L, D = x.shape
    if L < 2:
        # PyTorch's F.pad(mode='replicate') also degenerates here; Pallas would
        # fail silently (no VMEM bounds checks), so fail loudly instead.
        raise ValueError("Splitting requires sequence length L >= 2.")

    pad_odd = (L % 2 == 1)
    flag = 1 if pad_odd else 0  # flag == 2 (even shorter than odd) is unreachable

    if pad_odd:
        # Append a copy of row L-2 so that, after pairing, the odd stream's
        # last slot holds a replica of its last row (== F.pad replicate).
        # Even L (the common case) skips this copy entirely.
        x = jnp.concatenate([x, x[:, L - 2:L - 1, :]], axis=1)

    P = x.shape[1] // 2                 # number of (even, odd) pairs == output rows
    N = B * P                           # total packed rows across the batch
    x_packed = x.reshape(N, 2 * D)      # free metadata reshape (row-major layout)

    itemsize = jnp.dtype(x.dtype).itemsize
    # Per grid step, double-buffered: input (TR, 2D) + two outputs (TR, D).
    bytes_per_row = 2 * (2 * D + D + D) * itemsize   # = 8 * D * itemsize
    tr = max(1, vmem_budget_bytes // bytes_per_row)
    if max_rows_per_tile is not None:
        tr = min(tr, max_rows_per_tile)
    if tr >= N:
        TR = N                           # single tile: full-extent block is always legal
    else:
        TR = max(8, (tr // 8) * 8)       # sublane-aligned tile (multiple of 8)
    NT = pl.cdiv(N, TR)

    kernel = _make_split_kernel(D)

    even, odd = pl.pallas_call(
        kernel,
        out_shape=(
            jax.ShapeDtypeStruct((N, D), x.dtype),
            jax.ShapeDtypeStruct((N, D), x.dtype),
        ),
        grid_spec=pltpu.PrefetchScalarGridSpec(
            num_scalar_prefetch=0,
            grid=(NT,),
            in_specs=[pl.BlockSpec((TR, 2 * D), lambda t: (t, 0))],
            out_specs=(
                pl.BlockSpec((TR, D), lambda t: (t, 0)),
                pl.BlockSpec((TR, D), lambda t: (t, 0)),
            ),
        ),
        compiler_params=pltpu.CompilerParams(
            dimension_semantics=("parallel",),
            vmem_limit_bytes=32 * 1024 * 1024,
        ),
        cost_estimate=pl.CostEstimate(
            flops=0,
            transcendentals=0,
            bytes_accessed=4 * N * D * itemsize,   # read packed + write even + odd
        ),
    )(x_packed)

    # Free metadata reshapes back to (B, P, D).
    return (even.reshape(B, P, D), odd.reshape(B, P, D)), flag


def _reference(x):
    """Pure-JAX reference mirroring the PyTorch module."""
    even = x[:, ::2, :]
    odd = x[:, 1::2, :]
    flag = 0
    if odd.shape[1] < even.shape[1]:
        pad = even.shape[1] - odd.shape[1]
        odd = jnp.concatenate([odd, jnp.repeat(odd[:, -1:, :], pad, axis=1)], axis=1)
        flag = 1
    return (even, odd), flag


if __name__ == "__main__":
    key = jax.random.PRNGKey(0)
    k1, k2, k3 = jax.random.split(key, 3)

    # Odd sequence length -> exercises the replicate-pad branch (flag == 1).
    x_odd = jax.random.normal(k1, (2, 9, 16), dtype=jnp.float32)
    (even_o, odd_o), flag_o = splitting(x_odd)
    jax.block_until_ready((even_o, odd_o))

    # Even sequence length -> no padding (flag == 0), zero-copy wrapper path.
    x_even = jax.random.normal(k2, (2, 8, 16), dtype=jnp.float32)
    (even_e, odd_e), flag_e = splitting(x_even)
    jax.block_until_ready((even_e, odd_e))

    # Lane-dense (D == 128) case with a forced small tile to exercise the
    # multi-tile grid path (including a remainder tile: 48 rows, TR = 16).
    x_big = jax.random.normal(k3, (2, 48, 128), dtype=jnp.float32)
    (even_b, odd_b), flag_b = splitting(x_big, max_rows_per_tile=16)
    jax.block_until_ready((even_b, odd_b))

    # Check against the pure-JAX reference.
    (ref_even_o, ref_odd_o), ref_flag_o = _reference(x_odd)
    (ref_even_e, ref_odd_e), ref_flag_e = _reference(x_even)
    (ref_even_b, ref_odd_b), ref_flag_b = _reference(x_big)

    assert flag_o == ref_flag_o == 1
    assert flag_e == ref_flag_e == 0
    assert flag_b == ref_flag_b == 0
    assert even_o.shape == ref_even_o.shape and odd_o.shape == ref_odd_o.shape
    assert jnp.allclose(even_o, ref_even_o)
    assert jnp.allclose(odd_o, ref_odd_o)
    assert jnp.allclose(even_e, ref_even_e)
    assert jnp.allclose(odd_e, ref_odd_e)
    assert jnp.allclose(even_b, ref_even_b)
    assert jnp.allclose(odd_b, ref_odd_b)

    print("KERNEL_OK")
</pallas_src>

<mosaic_0001>
module attributes {stable_mosaic.version = 11 : i64} {
  func.func @split_kernel(%arg0: i32, %arg1: memref<10x32xf32, #tpu.memory_space<vmem>>, %arg2: memref<10x16xf32, #tpu.memory_space<vmem>>, %arg3: memref<10x16xf32, #tpu.memory_space<vmem>>) attributes {dimension_semantics = [#tpu.dimension_semantics<parallel>], iteration_bounds = array<i64: 1>, scalar_prefetch = 0 : i64, scratch_operands = 0 : i64, tpu.core_type = #tpu.core_type<tc>, window_params = [{transform_indices = @transform_0, window_bounds = array<i64: 10, 32>}, {transform_indices = @transform_1, window_bounds = array<i64: 10, 16>}, {transform_indices = @transform_2, window_bounds = array<i64: 10, 16>}]} {
    %c0 = arith.constant 0 : index
    %c0_0 = arith.constant 0 : index
    %0 = vector.load %arg1[%c0, %c0_0] : memref<10x32xf32, #tpu.memory_space<vmem>>, vector<10x16xf32>
    %c0_1 = arith.constant 0 : index
    %c0_2 = arith.constant 0 : index
    %1 = vector.load %arg2[%c0_1, %c0_2] : memref<10x16xf32, #tpu.memory_space<vmem>>, vector<10x16xf32>
    tpu.vector_store %arg2[%c0_1, %c0_2], %0 {strides = array<i32>} : memref<10x16xf32, #tpu.memory_space<vmem>>, vector<10x16xf32>,
    %c0_3 = arith.constant 0 : index
    %c16 = arith.constant 16 : index
    %2 = vector.load %arg1[%c0_3, %c16] : memref<10x32xf32, #tpu.memory_space<vmem>>, vector<10x16xf32>
    %c0_4 = arith.constant 0 : index
    %c0_5 = arith.constant 0 : index
    %3 = vector.load %arg3[%c0_4, %c0_5] : memref<10x16xf32, #tpu.memory_space<vmem>>, vector<10x16xf32>
    tpu.vector_store %arg3[%c0_4, %c0_5], %2 {strides = array<i32>} : memref<10x16xf32, #tpu.memory_space<vmem>>, vector<10x16xf32>,
    return
  }
  func.func @transform_0(%arg0: i32) -> (i32, i32) {
    %c0_i32 = arith.constant 0 : i32
    %c0_i32_0 = arith.constant 0 : i32
    return %arg0, %c0_i32 : i32, i32
  }
  func.func @transform_1(%arg0: i32) -> (i32, i32) {
    %c0_i32 = arith.constant 0 : i32
    %c0_i32_0 = arith.constant 0 : i32
    return %arg0, %c0_i32 : i32, i32
  }
  func.func @transform_2(%arg0: i32) -> (i32, i32) {
    %c0_i32 = arith.constant 0 : i32
    %c0_i32_0 = arith.constant 0 : i32
    return %arg0, %c0_i32 : i32, i32
  }
}

</mosaic_0001>

<bundles_post_ra>
// kernel: tpu_custom_call.1
= control target key start
LH: loop header
LB: loop body
LE: loop exit
PB: predicated region body
PF: predicated region fallthrough
CT: control target
= control target key end

     0   :  { %8 = vsyncpa [#allocation3], 0  ;;  %s225_s0 = inlined_call_operand.hbm [shape: f32[10,32], index: 0, kind: input, shape index: {}]   ;;  %s226_s1 = inlined_call_operand.hbm [shape: f32[10,16], index: 1, kind: output, shape index: {0}]   ;;  %s227_s2 = inlined_call_operand.hbm [shape: f32[10,16], index: 2, kind: output, shape index: {1}]  }
   0x1   :  { %9 = vsyncpa [#allocation4], 0 }
   0x2   :  { %10 = vsyncpa [#allocation7], 0  ;;  %s155_s9 = smov [#allocation2]   ;;  %s83_s13 = scalar_lea.hbm %s225_s0, 256 }
   0x3   :  { %s16_s10 = sshll.u32 %s155_s9, 4  ;;  %p84_p0 = scmp.ne.s32.totalorder %s225_s0, %s83_s13  ;;  %s17_s10 = int_to_ptr.vmem [resolvable:$true] %s16_s10 }
   0x4   :  { %p87_p1 = scmp.lt.u32.totalorder %s83_s13, %s225_s0 }
   0x6   :  { %p89_p2 = pnand %p87_p1, %p84_p0 }
   0x8   :  { %92 = shalt.err (!%p89_p2)
}
   0x9   :  { %s93_s18 = scalar_lea.vmem %s17_s10, 256  ;;  %p98_p4 = scmp.lt.s32.totalorder %s17_s10, %s17_s10 }
   0xa   :  { %p94_p3 = scmp.ne.s32.totalorder %s17_s10, %s93_s18  ;;  %p99_p5 = scmp.lt.s32.totalorder %s93_s18, %s93_s18 }
   0xc   :  { %p100_p6 = por %p99_p5, %p98_p4 }
   0xe   :  { %p101_p7 = pnand %p100_p6, %p94_p3 }
  0x10   :  { %104 = shalt.err (!%p101_p7)
}
  0x11   :  { %s156_s19 = smov 128   ;;  %s157_s20 = smov 8  }
  0x12   :  { %22 = dma.hbm_to_vmem [thread:$0]  %s225_s0, 256, %s17_s10, [#allocation3], %s156_s19, %s156_s19, %s157_s20  }
  0x13   :  { %149 = dma.done.wait [#allocation3], 256  }
  0x14   :  { %150 = vsyncadd [#allocation3], 4294967040  ;;  %s158_s23 = smov [#allocation5]   ;;  %vm30_vm0 = vcmask 123904   ;;  %v32_v0 = vld [vmem:[#allocation2] sm:$0xff]  ;;  %vm28_vm1 = vcmask 130048  }
  0x15   :  { %s49_s24 = sshll.u32 %s158_s23, 4  ;;  %v27_v1 = vld [vmem:[#allocation2 + $0x8] sm:$0x3]  ;;  %s159_s25 = smov 112   ;;  %29 = vst.msk [vmem:[#allocation5] sm:$0xff] %vm28_vm1, %v32_v0  ;;  %s50_s24 = int_to_ptr.vmem [resolvable:$true] %s49_s24 }
  0x16   :  { %36 = vrot.lane.b32.xlu0 %v32_v0, %s159_s25  ;;  %31 = vst.msk [vmem:[#allocation5 + $0x8] sm:$0x3] %vm30_vm0, %v27_v1  ;;  %v33_v2 = vld [vmem:[#allocation2 + $0x8] sm:$0x3]  ;;  %s105_s26 = scalar_lea.vmem %s50_s24, 256  ;;  %p110_p9 = scmp.lt.s32.totalorder %s50_s24, %s50_s24 }
  0x17   :  { %p106_p8 = scmp.ne.s32.totalorder %s50_s24, %s105_s26  ;;  %p111_p10 = scmp.lt.s32.totalorder %s105_s26, %s105_s26 }
  0x19   :  { %p112_p11 = por %p111_p10, %p110_p9 }
  0x1b   :  { %p113_p12 = pnand %p112_p11, %p106_p8 }
  0x1d   :  { %116 = shalt.err (!%p113_p12)
}
  0x1e   :  { %s117_s28 = scalar_lea.hbm %s226_s1, 256 }
  0x1f   :  { %p118_p13 = scmp.ne.s32.totalorder %s226_s1, %s117_s28  ;;  %p121_p0 = scmp.lt.u32.totalorder %s117_s28, %s226_s1 }
  0x21   :  { %p123_p1 = pnand %p121_p0, %p118_p13 }
  0x23   :  { %126 = shalt.err (!%p123_p1)
}
  0x24   :  { %55 = dma.vmem_to_hbm [thread:$0]  %s50_s24, 256, %s226_s1, [#allocation4], %s156_s19, %s156_s19, %s157_s20  }
  0x25   :  { %38 = vrot.lane.b32.xlu0 %v33_v2, %s159_s25  ;;  %s160_s7 = smov [#allocation6]  }
  0x26   :  { %s61_s8 = sshll.u32 %s160_s7, 4  ;;  %s62_s8 = int_to_ptr.vmem [resolvable:$true] %s61_s8 }
  0x27   :  { %s127_s9 = scalar_lea.vmem %s62_s8, 256  ;;  %p132_p3 = scmp.lt.s32.totalorder %s62_s8, %s62_s8 }
  0x28   :  { %p128_p2 = scmp.ne.s32.totalorder %s62_s8, %s127_s9  ;;  %p133_p4 = scmp.lt.s32.totalorder %s127_s9, %s127_s9 }
  0x2a   :  { %p134_p5 = por %p133_p4, %p132_p3 }
  0x2c   :  { %p135_p6 = pnand %p134_p5, %p128_p2 }
  0x88   :  { %v37_v3 = vpop.permute.xlu0 %36 }
  0x89   :  { %42 = vst.msk [vmem:[#allocation6] sm:$0xff] %vm28_vm1, %v37_v3 }
  0x97   :  { %v39_v4 = vpop.permute.xlu0 %38 }
  0x98   :  { %43 = vst.msk [vmem:[#allocation6 + $0x8] sm:$0x3] %vm30_vm0, %v39_v4 }
  0x99   :  { %138 = shalt.err (!%p135_p6)
}
  0x9a   :  { %s139_s1 = scalar_lea.hbm %s227_s2, 256 }
  0x9b   :  { %p140_p7 = scmp.ne.s32.totalorder %s227_s2, %s139_s1  ;;  %p143_p8 = scmp.lt.u32.totalorder %s139_s1, %s227_s2 }
  0x9d   :  { %p145_p9 = pnand %p143_p8, %p140_p7 }
  0x9f   :  { %148 = shalt.err (!%p145_p9)
}
  0xa0   :  { %67 = dma.vmem_to_hbm [thread:$0]  %s62_s8, 256, %s227_s2, [#allocation7], %s156_s19, %s156_s19, %s157_s20  }
  0xa1   :  { %151 = dma.done.wait [#allocation4], 256  }
  0xa2   :  { %152 = vsyncadd [#allocation4], 4294967040 }
  0xa3   :  { %153 = dma.done.wait [#allocation7], 256  }
  0xa4   :  { %154 = vsyncadd [#allocation7], 4294967040 }
  0xa5   :  { %74 = vsyncpa [#allocation3], 1 }
  0xa6   :  { %75 = vsyncpa [#allocation4], 1 }
  0xa7   :  { %76 = vsyncpa [#allocation7], 1 }

</bundles_post_ra>
